<compile_context>
chip_gen: v7x
topology: tpu7x:2x2x1
jax: 0.10.0
libtpu: 0.0.40
codegen_flags: <defaults>
</compile_context>

<pallas_src>
import jax
import jax.numpy as jnp
from jax.experimental import pallas as pl
from jax.experimental.pallas import tpu as pltpu


def gcn_kernel(x_ref, A_ref, w1_ref, pb_ref, theta_ref, o_ref):
    """Fused GCNModel forward (eval mode).

    x_ref    : (B, D)   [embeddings | bn1-folded continuous]
    A_ref    : (B, B)   adjacency subset (identity when original sum == 0)
    w1_ref   : (D, 16)  lin1 weight, transposed to (in, out)
    pb_ref   : (8, 32)  packed params:
                        row0[:16] = b1, row1[:16] = bn2 scale, row2[:16] = bn2 shift,
                        row3[:32] = bn3-folded lin3 weight, row4[0] = folded lin3 bias
    theta_ref: (16, 32) GCN Theta weight, transposed (no bias)
    o_ref    : (B, 1)
    """
    f32 = jnp.float32
    x = x_ref[...]                                                    # (B, D)

    # lin1 + ReLU   (emb_drop / drops are identity in eval)
    z = jnp.dot(x, w1_ref[...], preferred_element_type=f32) + pb_ref[0:1, 0:16]
    z = jnp.maximum(z, 0.0)                                           # (B, 16)

    # bn2 (eval) as a single fused affine (VPU)
    z = z * pb_ref[1:2, 0:16] + pb_ref[2:3, 0:16]                     # (B, 16)

    # GCN layer: relu(Theta(A @ z)); A == I exactly reproduces the
    # "A.sum()==0 -> relu(Theta(z))" branch of GCNLayer.
    m = jnp.dot(A_ref[...], z, preferred_element_type=f32)            # (B, 16)
    h = jnp.dot(m, theta_ref[...], preferred_element_type=f32)        # (B, 32)
    h = jnp.maximum(h, 0.0)

    # bn3-folded lin3 as VPU multiply + XLU lane reduce (output width is 1,
    # so a rank-1 MXU matmul buys nothing and would cost another operand DMA).
    out = jnp.sum(h * pb_ref[3:4, :], axis=-1, keepdims=True) + pb_ref[4:5, 0:1]
    o_ref[...] = out.astype(o_ref.dtype)                              # (B, 1)


def _bn_fold(gamma, beta, mean, var, eps=1e-5):
    s = gamma / jnp.sqrt(var + eps)
    return s, beta - mean * s


def gcn_model_forward(params, x_cat, x_cont, adj_matrix, batched_nodes_indices):
    B = x_cat.shape[0]

    # --- glue: embedding lookups + concat (gather; eval dropout = identity) ---
    x1 = jnp.concatenate(
        [tbl[x_cat[:, i]] for i, tbl in enumerate(params['emb_tables'])], axis=1)

    # --- glue: bn1 (eval) folded directly into the continuous features ---
    s1, t1 = _bn_fold(params['bn1_gamma'], params['bn1_beta'],
                      params['bn1_mean'], params['bn1_var'])
    x2 = x_cont * s1[None, :] + t1[None, :]
    x = jnp.concatenate([x1, x2], axis=1).astype(jnp.float32)         # (B, D)

    # --- glue: adjacency subset (index_select on both dims, modulo-calibrated) ---
    idx = batched_nodes_indices % adj_matrix.shape[0]
    A = adj_matrix[idx][:, idx].astype(jnp.float32)                   # (B, B)
    # GCNLayer branch hoisted to the wrapper: all-zero A -> identity matrix.
    A = jnp.where(jnp.sum(A) == 0.0, jnp.eye(B, dtype=jnp.float32), A)

    # --- fold bn2 / bn3 and pack all small vectors into one (8, 32) block ---
    s2, t2 = _bn_fold(params['bn2_gamma'], params['bn2_beta'],
                      params['bn2_mean'], params['bn2_var'])
    s3, t3 = _bn_fold(params['bn3_gamma'], params['bn3_beta'],
                      params['bn3_mean'], params['bn3_var'])
    w3_f = params['w3'][0] * s3                                        # (32,)
    b3_f = params['b3'][0] + jnp.dot(params['w3'][0], t3)              # scalar

    pblock = jnp.zeros((8, 32), jnp.float32)
    pblock = pblock.at[0, 0:16].set(params['b1'])
    pblock = pblock.at[1, 0:16].set(s2)
    pblock = pblock.at[2, 0:16].set(t2)
    pblock = pblock.at[3, :].set(w3_f)
    pblock = pblock.at[4, 0].set(b3_f)

    inputs = (x, A, params['w1'].T, pblock, params['theta'].T)

    vmem = pl.BlockSpec(memory_space=pltpu.MemorySpace.VMEM)
    out = pl.pallas_call(
        gcn_kernel,
        out_shape=jax.ShapeDtypeStruct((B, 1), jnp.float32),
        in_specs=[vmem] * len(inputs),
        out_specs=vmem,
    )(*inputs)
    return out


def gcn_model_reference(params, x_cat, x_cont, adj_matrix, batched_nodes_indices):
    """Pure-JAX eval-mode reference mirroring GCNModel.forward."""
    eps = 1e-5
    x1 = jnp.concatenate(
        [tbl[x_cat[:, i]] for i, tbl in enumerate(params['emb_tables'])], axis=1)
    x2 = ((x_cont - params['bn1_mean']) / jnp.sqrt(params['bn1_var'] + eps)
          * params['bn1_gamma'] + params['bn1_beta'])
    x = jnp.concatenate([x1, x2], axis=1)
    x = jax.nn.relu(x @ params['w1'].T + params['b1'])
    x = ((x - params['bn2_mean']) / jnp.sqrt(params['bn2_var'] + eps)
         * params['bn2_gamma'] + params['bn2_beta'])
    idx = batched_nodes_indices % adj_matrix.shape[0]
    A = adj_matrix[idx][:, idx].astype(jnp.float32)
    gcn_in = jnp.where(jnp.sum(A) == 0.0, x, A @ x)
    x = jax.nn.relu(gcn_in @ params['theta'].T)
    x = ((x - params['bn3_mean']) / jnp.sqrt(params['bn3_var'] + eps)
         * params['bn3_gamma'] + params['bn3_beta'])
    return x @ params['w3'].T + params['b3']


def init_params(key, cat_levels, n_cont):
    emb_dims = [min(50, (c + 1) // 2) for c in cat_levels]
    n_emb = sum(emb_dims)
    D = n_emb + n_cont
    keys = jax.random.split(key, len(cat_levels) + 3)

    def xavier(k, shape):                      # PyTorch (out, in) convention
        fan_out, fan_in = shape
        limit = jnp.sqrt(6.0 / (fan_in + fan_out))
        return jax.random.uniform(k, shape, jnp.float32, -limit, limit)

    emb_tables = [jax.random.uniform(keys[i], (c, d), jnp.float32)
                  for i, (c, d) in enumerate(zip(cat_levels, emb_dims))]
    k = len(cat_levels)
    params = dict(
        emb_tables=emb_tables,
        w1=xavier(keys[k], (16, D)),    b1=jnp.full((16,), 0.01, jnp.float32),
        theta=xavier(keys[k + 1], (32, 16)),
        w3=xavier(keys[k + 2], (1, 32)), b3=jnp.full((1,), 0.01, jnp.float32),
        bn1_gamma=jnp.ones((n_cont,), jnp.float32),
        bn1_beta=jnp.zeros((n_cont,), jnp.float32),
        bn1_mean=jnp.zeros((n_cont,), jnp.float32),
        bn1_var=jnp.ones((n_cont,), jnp.float32),
        bn2_gamma=jnp.ones((16,), jnp.float32),
        bn2_beta=jnp.zeros((16,), jnp.float32),
        bn2_mean=jnp.zeros((16,), jnp.float32),
        bn2_var=jnp.ones((16,), jnp.float32),
        bn3_gamma=jnp.ones((32,), jnp.float32),
        bn3_beta=jnp.zeros((32,), jnp.float32),
        bn3_mean=jnp.zeros((32,), jnp.float32),
        bn3_var=jnp.ones((32,), jnp.float32),
    )
    return params


if __name__ == "__main__":
    key = jax.random.PRNGKey(0)
    B, N = 16, 32                 # batch, total graph nodes
    cat_levels = [5, 7, 4]        # model_cat_unique_levels -> n_emb = 3 + 4 + 2 = 9
    n_cont = 4

    kp, kc, kx, ka, ki = jax.random.split(key, 5)
    params = init_params(kp, cat_levels, n_cont)

    raw = jax.random.randint(kc, (B, len(cat_levels)), 0, 1000)
    levels = jnp.array(cat_levels, dtype=jnp.int32)[None, :]
    x_cat = raw % levels                                         # (B, n_cat)
    x_cont = jax.random.normal(kx, (B, n_cont), jnp.float32)     # (B, n_cont)
    adj = (jax.random.uniform(ka, (N, N)) < 0.2).astype(jnp.float32)
    batched_nodes_indices = jax.random.permutation(ki, N)[:B]    # (B,)

    out = gcn_model_forward(params, x_cat, x_cont, adj, batched_nodes_indices)
    jax.block_until_ready(out)
    assert out.shape == (B, 1)

    ref = gcn_model_reference(params, x_cat, x_cont, adj, batched_nodes_indices)
    assert jnp.allclose(out, ref, rtol=5e-2, atol=5e-2), \
        float(jnp.max(jnp.abs(out - ref)))
    print("KERNEL_OK")
</pallas_src>

<mosaic_0001>
module attributes {stable_mosaic.version = 11 : i64} {
  func.func @gcn_kernel(%arg0: memref<16x13xf32, #tpu.memory_space<vmem>>, %arg1: memref<16x16xf32, #tpu.memory_space<vmem>>, %arg2: memref<13x16xf32, #tpu.memory_space<vmem>>, %arg3: memref<8x32xf32, #tpu.memory_space<vmem>>, %arg4: memref<16x32xf32, #tpu.memory_space<vmem>>, %arg5: memref<16x1xf32, #tpu.memory_space<vmem>>) attributes {dimension_semantics = [], scalar_prefetch = 0 : i64, scratch_operands = 0 : i64, tpu.core_type = #tpu.core_type<tc>} {
    %c0 = arith.constant 0 : index
    %c0_0 = arith.constant 0 : index
    %0 = vector.load %arg0[%c0, %c0_0] : memref<16x13xf32, #tpu.memory_space<vmem>>, vector<16x13xf32>
    %c0_1 = arith.constant 0 : index
    %c0_2 = arith.constant 0 : index
    %1 = vector.load %arg2[%c0_1, %c0_2] : memref<13x16xf32, #tpu.memory_space<vmem>>, vector<13x16xf32>
    %cst = arith.constant dense<0.000000e+00> : vector<16x16xf32>
    %2 = tpu.matmul %0, %1, %cst {dimension_numbers = #tpu.dot_dimension_numbers<[1], [0], [0], [1], [0, 0, 1, 1], [], []>} : vector<16x13xf32>, vector<13x16xf32>, vector<16x16xf32> -> vector<16x16xf32>
    %c0_3 = arith.constant 0 : index
    %c0_4 = arith.constant 0 : index
    %3 = vector.load %arg3[%c0_3, %c0_4] : memref<8x32xf32, #tpu.memory_space<vmem>>, vector<1x16xf32>
    %4 = vector.broadcast %3 : vector<1x16xf32> to vector<16x16xf32>
    %5 = arith.addf %2, %4 : vector<16x16xf32>
    %cst_5 = arith.constant 0.000000e+00 : f32
    %6 = vector.broadcast %cst_5 : f32 to vector<16x16xf32>
    %7 = arith.maximumf %5, %6 : vector<16x16xf32>
    %c1 = arith.constant 1 : index
    %c0_6 = arith.constant 0 : index
    %8 = vector.load %arg3[%c1, %c0_6] : memref<8x32xf32, #tpu.memory_space<vmem>>, vector<1x16xf32>
    %9 = vector.broadcast %8 : vector<1x16xf32> to vector<16x16xf32>
    %10 = arith.mulf %7, %9 : vector<16x16xf32>
    %c2 = arith.constant 2 : index
    %c0_7 = arith.constant 0 : index
    %11 = vector.load %arg3[%c2, %c0_7] : memref<8x32xf32, #tpu.memory_space<vmem>>, vector<1x16xf32>
    %12 = vector.broadcast %11 : vector<1x16xf32> to vector<16x16xf32>
    %13 = arith.addf %10, %12 : vector<16x16xf32>
    %c0_8 = arith.constant 0 : index
    %c0_9 = arith.constant 0 : index
    %14 = vector.load %arg1[%c0_8, %c0_9] : memref<16x16xf32, #tpu.memory_space<vmem>>, vector<16x16xf32>
    %cst_10 = arith.constant dense<0.000000e+00> : vector<16x16xf32>
    %15 = tpu.matmul %14, %13, %cst_10 {dimension_numbers = #tpu.dot_dimension_numbers<[1], [0], [0], [1], [0, 0, 1, 1], [], []>} : vector<16x16xf32>, vector<16x16xf32>, vector<16x16xf32> -> vector<16x16xf32>
    %c0_11 = arith.constant 0 : index
    %c0_12 = arith.constant 0 : index
    %16 = vector.load %arg4[%c0_11, %c0_12] : memref<16x32xf32, #tpu.memory_space<vmem>>, vector<16x32xf32>
    %cst_13 = arith.constant dense<0.000000e+00> : vector<16x32xf32>
    %17 = tpu.matmul %15, %16, %cst_13 {dimension_numbers = #tpu.dot_dimension_numbers<[1], [0], [0], [1], [0, 0, 1, 1], [], []>} : vector<16x16xf32>, vector<16x32xf32>, vector<16x32xf32> -> vector<16x32xf32>
    %cst_14 = arith.constant 0.000000e+00 : f32
    %18 = vector.broadcast %cst_14 : f32 to vector<16x32xf32>
    %19 = arith.maximumf %17, %18 : vector<16x32xf32>
    %c3 = arith.constant 3 : index
    %c0_15 = arith.constant 0 : index
    %20 = vector.load %arg3[%c3, %c0_15] : memref<8x32xf32, #tpu.memory_space<vmem>>, vector<1x32xf32>
    %21 = vector.broadcast %20 : vector<1x32xf32> to vector<16x32xf32>
    %22 = arith.mulf %19, %21 : vector<16x32xf32>
    %cst_16 = arith.constant dense<0.000000e+00> : vector<16xf32>
    %23 = vector.multi_reduction <add>, %22, %cst_16 [1] : vector<16x32xf32> to vector<16xf32>
    %24 = vector.shape_cast %23 : vector<16xf32> to vector<16x1xf32>
    %c4 = arith.constant 4 : index
    %c0_17 = arith.constant 0 : index
    %25 = vector.load %arg3[%c4, %c0_17] : memref<8x32xf32, #tpu.memory_space<vmem>>, vector<1x1xf32>
    %26 = vector.broadcast %25 : vector<1x1xf32> to vector<16x1xf32>
    %27 = arith.addf %24, %26 : vector<16x1xf32>
    %c0_18 = arith.constant 0 : index
    %c0_19 = arith.constant 0 : index
    %28 = vector.load %arg5[%c0_18, %c0_19] : memref<16x1xf32, #tpu.memory_space<vmem>>, vector<16x1xf32>
    tpu.vector_store %arg5[%c0_18, %c0_19], %27 {strides = array<i32>} : memref<16x1xf32, #tpu.memory_space<vmem>>, vector<16x1xf32>,
    return
  }
}

</mosaic_0001>

<bundles_post_ra>
// kernel: tpu_custom_call.1
= control target key start
LH: loop header
LB: loop body
LE: loop exit
PB: predicated region body
PF: predicated region fallthrough
CT: control target
= control target key end

     0   :  { %10 = vsyncpa [#allocation3], 0  ;;  %s682_s0 = inlined_call_operand.hbm [shape: f32[16,13], index: 0, kind: input, shape index: {}]   ;;  %s683_s1 = inlined_call_operand.hbm [shape: f32[16,16], index: 1, kind: input, shape index: {}]   ;;  %s684_s2 = inlined_call_operand.hbm [shape: f32[13,16], index: 2, kind: input, shape index: {}]   ;;  %s685_s3 = inlined_call_operand.vmem [shape: f32[8,32], index: 3, kind: input, shape index: {}]   ;;  %s686_s4 = inlined_call_operand.hbm [shape: f32[16,32], index: 4, kind: input, shape index: {}]   ;;  %s687_s5 = inlined_call_operand.vmem [shape: f32[16,1], index: 5, kind: output, shape index: {}]  }
   0x1   :  { %11 = vsyncpa [#allocation5], 0 }
   0x2   :  { %12 = vsyncpa [#allocation8], 0  ;;  %s546_s18 = smov [#allocation4]   ;;  %s547_s20 = smov [#allocation2]  }
   0x3   :  { %s30_s19 = sshll.u32 %s546_s18, 4  ;;  %s18_s21 = sshll.u32 %s547_s20, 4  ;;  %s31_s19 = int_to_ptr.vmem [resolvable:$true] %s30_s19  ;;  %s583_s21 = int_to_ptr.vmem [resolvable:$true] %s18_s21 }
   0x4   :  { %s452_s24 = scalar_lea.hbm %s683_s1, 256 }
   0x5   :  { %p453_p0 = scmp.ne.s32.totalorder %s683_s1, %s452_s24  ;;  %p456_p1 = scmp.lt.u32.totalorder %s452_s24, %s683_s1 }
   0x7   :  { %p458_p2 = pnand %p456_p1, %p453_p0 }
   0x9   :  { %461 = shalt.err (!%p458_p2)
}
   0xa   :  { %s462_s29 = scalar_lea.vmem %s31_s19, 256  ;;  %p467_p4 = scmp.lt.s32.totalorder %s31_s19, %s31_s19 }
   0xb   :  { %p463_p3 = scmp.ne.s32.totalorder %s31_s19, %s462_s29  ;;  %p468_p5 = scmp.lt.s32.totalorder %s462_s29, %s462_s29 }
   0xd   :  { %p469_p6 = por %p468_p5, %p467_p4 }
   0xf   :  { %p470_p7 = pnand %p469_p6, %p463_p3 }
  0x11   :  { %473 = shalt.err (!%p470_p7)
}
  0x12   :  { %s548_s30 = smov 128   ;;  %s549_s6 = smov 8  }
  0x13   :  { %36 = dma.hbm_to_vmem [thread:$0]  %s683_s1, 256, %s31_s19, [#allocation5], %s548_s30, %s548_s30, %s549_s6  }
  0x14   :  { %s474_s11 = scalar_lea.hbm %s682_s0, 256 }
  0x15   :  { %p475_p8 = scmp.ne.s32.totalorder %s682_s0, %s474_s11  ;;  %p478_p9 = scmp.lt.u32.totalorder %s474_s11, %s682_s0 }
  0x17   :  { %p480_p10 = pnand %p478_p9, %p475_p8 }
  0x19   :  { %483 = shalt.err (!%p480_p10)
}
  0x1a   :  { %s484_s16 = scalar_lea.vmem %s583_s21, 256  ;;  %p489_p12 = scmp.lt.s32.totalorder %s583_s21, %s583_s21 }
  0x1b   :  { %p485_p11 = scmp.ne.s32.totalorder %s583_s21, %s484_s16  ;;  %p490_p13 = scmp.lt.s32.totalorder %s484_s16, %s484_s16 }
  0x1d   :  { %p491_p0 = por %p490_p13, %p489_p12 }
  0x1f   :  { %p492_p1 = pnand %p491_p0, %p485_p11 }
  0x21   :  { %495 = shalt.err (!%p492_p1)
}
  0x22   :  { %24 = dma.hbm_to_vmem [thread:$0]  %s682_s0, 256, %s583_s21, [#allocation3], %s548_s30, %s548_s30, %s549_s6  }
  0x23   :  { %s550_s18 = smov [#allocation6]   ;;  %s551_s20 = smov [#allocation7]  }
  0x24   :  { %s42_s19 = sshll.u32 %s550_s18, 4  ;;  %s56_s22 = sshll.u32 %s551_s20, 4  ;;  %s43_s19 = int_to_ptr.vmem [resolvable:$true] %s42_s19  ;;  %s620_s22 = int_to_ptr.vmem [resolvable:$true] %s56_s22 }
  0x25   :  { %s496_s25 = scalar_lea.hbm %s684_s2, 256 }
  0x26   :  { %p497_p2 = scmp.ne.s32.totalorder %s684_s2, %s496_s25  ;;  %p500_p3 = scmp.lt.u32.totalorder %s496_s25, %s684_s2 }
  0x28   :  { %p502_p4 = pnand %p500_p3, %p497_p2 }
  0x2a   :  { %505 = shalt.err (!%p502_p4)
}
  0x2b   :  { %s506_s0 = scalar_lea.vmem %s43_s19, 256  ;;  %p511_p6 = scmp.lt.s32.totalorder %s43_s19, %s43_s19 }
  0x2c   :  { %p507_p5 = scmp.ne.s32.totalorder %s43_s19, %s506_s0  ;;  %p512_p7 = scmp.lt.s32.totalorder %s506_s0, %s506_s0 }
  0x2e   :  { %p513_p8 = por %p512_p7, %p511_p6 }
  0x30   :  { %p514_p9 = pnand %p513_p8, %p507_p5 }
  0x32   :  { %517 = shalt.err (!%p514_p9)
}
  0x33   :  { %48 = dma.hbm_to_vmem [thread:$0]  %s684_s2, 256, %s43_s19, [#allocation5], %s548_s30, %s548_s30, %s549_s6  }
  0x34   :  { %s518_s10 = scalar_lea.hbm %s686_s4, 256 }
  0x35   :  { %p519_p10 = scmp.ne.s32.totalorder %s686_s4, %s518_s10  ;;  %p522_p11 = scmp.lt.u32.totalorder %s518_s10, %s686_s4 }
  0x37   :  { %p524_p12 = pnand %p522_p11, %p519_p10 }
  0x39   :  { %527 = shalt.err (!%p524_p12)
}
  0x3a   :  { %s528_s15 = scalar_lea.vmem %s620_s22, 256  ;;  %p533_p0 = scmp.lt.s32.totalorder %s620_s22, %s620_s22 }
  0x3b   :  { %p529_p13 = scmp.ne.s32.totalorder %s620_s22, %s528_s15  ;;  %p534_p1 = scmp.lt.s32.totalorder %s528_s15, %s528_s15 }
  0x3d   :  { %p535_p2 = por %p534_p1, %p533_p0 }
  0x3f   :  { %p536_p3 = pnand %p535_p2, %p529_p13 }
  0x41   :  { %539 = shalt.err (!%p536_p3)
}
  0x42   :  { %62 = dma.hbm_to_vmem [thread:$0]  %s686_s4, 256, %s620_s22, [#allocation8], %s548_s30, %s548_s30, %s549_s6  }
  0x43   :  { %540 = dma.done.wait [#allocation3], 256  }
  0x44   :  { %541 = vsyncadd [#allocation3], 4294967040 }
  0x45   :  { %542 = dma.done.wait [#allocation5], 512  }
  0x46   :  { %543 = vsyncadd [#allocation5], 4294966784 }
  0x47   :  { %544 = dma.done.wait [#allocation8], 256  }
  0x48   :  { %545 = vsyncadd [#allocation8], 4294967040  ;;  %vm91_vm0 = vcmask 1044480   ;;  %vm84_vm1 = vcmask 105472   ;;  %vm552_vm2 = vmmov 1   ;;  %v77_v0 = vld [vmem:[#allocation6] sm:$0xff] }
  0x49   :  { %vm432_vm3 = vmpackc.low %vm91_vm0, %vm552_vm2  ;;  %v78_v1 = vld [vmem:[#allocation6 + $0x8] sm:$0x1f]  ;;  %v75_v2 = vld [vmem:[#allocation2] sm:$0xff]  ;;  %vm188_vm4 = vcmask 130048   ;;  %vm362_vm5 = vcmask 261120   ;;  %vm376_vm6 = vcmask 7168  }
  0x4a   :  { %v431_v3 = vpack.c.bf16 %v78_v1, %v77_v0  ;;  %414 = vmatprep.mubr.msk.f32.mxu0 %vm84_vm1, %v75_v2  ;;  %v76_v4 = vld [vmem:[#allocation2 + $0x8] sm:$0xff]  ;;  %v186_v5 = vld [vmem:[#allocation4] sm:$0xff]  ;;  %v271_v7 = vld [vmem:[#allocation7 + $0x8] sm:$0xff] }
  0x4b   :  { %421 = vmatprep.mubr.msk.f32.mxu1 %vm188_vm4, %v186_v5  ;;  %v270_v6 = vld [vmem:[#allocation7] sm:$0xff]  ;;  %v386_v9 = vld [vmem:[%s685_s3] ss:$0 sm:$0xff]  ;;  %v390_v13 = vld [vmem:[%s685_s3 + $0x1] ss:$0 sm:$0xff] }
  0x4c   :  { %433 = vmatprep.subr.msk.bf16.mxu0 %vm432_vm3, %v431_v3  ;;  %v441_v8 = vpack.c.bf16 %v271_v7, %v270_v6  ;;  %v391_v17 = vld [vmem:[%s685_s3 + $0x2] ss:$0 sm:$0xff]  ;;  %v187_v23 = vld [vmem:[#allocation4 + $0x8] sm:$0xff]  ;;  %v396_v28 = vld [vmem:[%s685_s3 + $0x3] ss:$0 sm:$0xff] }
  0x4d   :  { %436 = vmatpush3.bf16.msk.msra.mxu0 %vm432_vm3, %v431_v3  ;;  %v397_v35 = vld [vmem:[%s685_s3 + $0x4] ss:$0 sm:$0xff] }
  0x4e   :  { %442 = vmatprep.subr.bf16.mxu0 %v441_v8 }
  0x50   :  { %415 = vmatmul.mubr.msk.f32.vlgmr.msra.gmra.mrb[0].mxu0 %vm84_vm1, %v76_v4 }
  0x51   :  { %444 = vmatpush3.bf16.msra.mxu0 %v441_v8 }
 0x123   :  { %v416_v10 = vpop.f32.mrb[0].mxu0 }
 0x124   :  { %v167_v11 = vadd.f32 %v416_v10, %v386_v9  ;;  %v161_v12 = vpop.f32.mrb[1].mxu0 }
 0x125   :  { %v162_v14 = vadd.f32 %v386_v9, %v161_v12 }
 0x126   :  { %v171_v15 = vmax.f32 %v167_v11, 0.0 }
 0x127   :  { %v170_v16 = vmax.f32 %v162_v14, 0.0 }
 0x128   :  { %v178_v18 = vmul.f32 %v390_v13, %v171_v15 }
 0x129   :  { %v177_v19 = vmul.f32 %v390_v13, %v170_v16 }
 0x12a   :  { %v185_v20 = vadd.f32 %v391_v17, %v178_v18 }
 0x12b   :  { %v184_v21 = vadd.f32 %v391_v17, %v177_v19 }
 0x12d   :  { %v437_v22 = vpack.c.bf16 %v185_v20, %v184_v21 }
 0x12f   :  { %438 = vmatprep.subr.bf16.mxu1 %v437_v22 }
 0x130   :  { %440 = vmatpush3.bf16.msra.mxu1 %v437_v22 }
 0x133   :  { %422 = vmatmul.mubr.msk.f32.vlgmr.msra.gmra.mrb[0].mxu1 %vm188_vm4, %v187_v23 }
 0x206   :  { %v423_v24 = vpop.f32.mrb[0].mxu1 }
 0x207   :  { %v261_v25 = vpop.f32.mrb[1].mxu1 }
 0x208   :  { %428 = vmatprep.mubr.msk.f32.mxu0 %vm188_vm4, %v261_v25 }
 0x209   :  { %429 = vmatmul.mubr.msk.f32.vlgmr.msra.gmra.mrb[2].mxu0 %vm188_vm4, %v423_v24 }
 0x2dc   :  { %v430_v26 = vpop.f32.mrb[2].mxu0 }
 0x2dd   :  { %v344_v27 = vpop.f32.mrb[3].mxu0  ;;  %v354_v29 = vmax.f32 %v430_v26, 0.0 }
 0x2de   :  { %v353_v30 = vmax.f32 %v344_v27, 0.0 }
 0x2df   :  { %v361_v33 = vmul.f32 %v396_v28, %v354_v29 }
 0x2e0   :  { %v360_v31 = vmul.f32 %v396_v28, %v353_v30 }
 0x2e1   :  { %v366_v34 = vsel %vm362_vm5, %v361_v33, 0.0 }
 0x2e2   :  { %v363_v32 = vsel %vm362_vm5, %v360_v31, 0.0 }
 0x2e3   :  { %364 = vadd.xlane.f32.xlu0 %v363_v32 }
 0x2e7   :  { %367 = vadd.xlane.f32.xlu0 %v366_v34 }
 0x370   :  { %v365_v36 = vpop.xlane.xlu0 %364 }
 0x371   :  { %v374_v37 = vadd.f32 %v397_v35, %v365_v36 }
 0x373   :  { %377 = vst.msk [vmem:[%s687_s5] sm:$0xff] %vm376_vm6, %v374_v37 }
 0x374   :  { %v368_v38 = vpop.xlane.xlu0 %367 }
 0x375   :  { %v375_v39 = vadd.f32 %v397_v35, %v368_v38 }
 0x377   :  { %378 = vst.msk [vmem:[%s687_s5 + $0x8] sm:$0xff] %vm376_vm6, %v375_v39 }
 0x378   :  { %383 = vsyncpa [#allocation3], 1 }
 0x379   :  { %384 = vsyncpa [#allocation5], 1 }
 0x37a   :  { %385 = vsyncpa [#allocation8], 1 }

</bundles_post_ra>
